<compile_context>
chip_gen: v6e
topology: v6e:2x2x1
jax: 0.10.0
libtpu: 0.0.40
codegen_flags: <defaults>
</compile_context>

<pallas_src>
import math

import jax
import jax.numpy as jnp
from jax import lax
from jax.experimental import pallas as pl
from jax.experimental.pallas import tpu as pltpu

# ---------------- configuration (consistent with the module) ----------------
C0 = 32                 # l=0 multiplicity
C1 = 32                 # l=1 multiplicity
D = C0 + 3 * C1         # irreps dim = 128 (irreps_in = irreps_hidden = irreps_out)
LAT = 64                # latent_dim
MAX_EDGE_TILE = 512     # edge rows per grid step (multiple of 8; ~1.5 MiB/tile even d-buffered)

# res_update coefficients: _res_update_params = 0 -> sigmoid(0) = 0.5
_CU = 0.5
C_OLD = 1.0 / math.sqrt(_CU * _CU + 1.0)
C_NEW = _CU * C_OLD


def _round_up(x, m):
    return ((x + m - 1) // m) * m


# ---------------- fused UpdateEdge kernel ----------------
def _update_edge_kernel(center_ref, neighbor_ref,          # (TE, 1) int32 row tiles
                        node_ref,                          # (Npad, D) bf16, VMEM-resident
                        hidden_ref, edge_ref, lat_ref,     # (TE, D), (TE, D), (TE, LAT) bf16
                        wtp_ref, btp_ref,                  # (3D, 2D) bf16, (1, 2D) f32
                        wpost_ref, bpost_ref,              # (D, D) bf16, (1, D) f32
                        wemb_ref, bemb_ref,                # (LAT, D) bf16, (1, D) f32
                        wres_ref, bres_ref,                # (D, D) bf16, (1, D) f32
                        out_ref):                          # (TE, D) f32
    bf = jnp.bfloat16
    te = hidden_ref.shape[0]
    n_nodes = node_ref.shape[0]

    # Vectorized one-hot MXU gather of center / neighbor node-feature rows
    # (replaces the serial per-row dynamic-sublane copy loop).
    node = node_ref[...]                                              # (Npad, D) bf16
    node_iota = lax.broadcasted_iota(jnp.int32, (te, n_nodes), 1)
    oh_c = (node_iota == center_ref[...]).astype(bf)                  # (TE, Npad)
    oh_n = (node_iota == neighbor_ref[...]).astype(bf)
    xc = jnp.dot(oh_c, node, preferred_element_type=jnp.float32).astype(bf)   # exact row select
    xn = jnp.dot(oh_n, node, preferred_element_type=jnp.float32).astype(bf)

    # tp: one (TE, 384) x (384, 256) matmul; concat boundaries sit on 128-lane edges.
    # Columns 0..D-1   : Gate input "pre" = [silu scalars (32) | vectors m-major (96)]
    # Columns D..2D-1  : gate logits, already broadcast over the 3 m positions by weight layout.
    # TODO(synk): SO2_Linear rotation / radial weights replaced by shared equivariant linear.
    x_cat = jnp.concatenate([xc, hidden_ref[...], xn], axis=-1)       # (TE, 3D) bf16
    acc = jnp.dot(x_cat, wtp_ref[...], preferred_element_type=jnp.float32) + btp_ref[...]

    pre = acc[:, :D]
    glog = acc[:, D:]
    lane = lax.broadcasted_iota(jnp.int32, pre.shape, 1)
    # Gate: silu on the 32 scalars, sigmoid(gate)*component on the vectors.
    # Select the sigmoid ARGUMENT (one EUP pass, one multiply), lane-dense, no 32-lane slices.
    g = jnp.where(lane < C0, pre, glog)
    gated = pre * jax.nn.sigmoid(g)

    # lin_post (equivariant Linear, bias only on scalars; zeros at init).
    post = jnp.dot(gated.astype(bf), wpost_ref[...],
                   preferred_element_type=jnp.float32) + bpost_ref[...]

    # edge_embed (LAT -> 64 weights) fused with E3ElementLinear channel weighting; per-m
    # broadcast of the 64 channel weights AND the C_NEW residual coefficient are folded into
    # wemb's 128 columns, so the epilogue is a single lane-dense multiply-add.
    w_e3 = jnp.dot(lat_ref[...], wemb_ref[...],
                   preferred_element_type=jnp.float32) + bemb_ref[...]

    # linear_res residual path (C_OLD folded into wres/bres).
    res = jnp.dot(edge_ref[...], wres_ref[...],
                  preferred_element_type=jnp.float32) + bres_ref[...]

    out_ref[...] = post * w_e3 + res


def update_edge(params, latents, node_features, hidden_features, edge_features,
                edge_index, edge_vector, active_edges):
    """UpdateEdge.forward: returns updated edge_features, shape (n_active_edges, D), f32."""
    del edge_vector  # TODO(synk): SO(2)/Wigner rotation not reproduced (see header).

    bf = jnp.bfloat16
    center = edge_index[0][active_edges].astype(jnp.int32)
    neighbor = edge_index[1][active_edges].astype(jnp.int32)
    # bf16 on the wire: halves HBM traffic for all streamed activations (kernel is mem-bound).
    lat = latents[active_edges].astype(bf)
    hidden = hidden_features.astype(bf)
    edge = edge_features.astype(bf)
    node = node_features.astype(bf)

    e = center.shape[0]
    te = min(MAX_EDGE_TILE, _round_up(e, 8))
    e_pad = _round_up(e, te)
    pad = e_pad - e
    if pad:
        center = jnp.pad(center, (0, pad))
        neighbor = jnp.pad(neighbor, (0, pad))
        hidden = jnp.pad(hidden, ((0, pad), (0, 0)))
        edge = jnp.pad(edge, ((0, pad), (0, 0)))
        lat = jnp.pad(lat, ((0, pad), (0, 0)))

    # Pad node table rows to a bf16 sublane multiple; padded rows are never selected.
    n_nodes = node.shape[0]
    n_pad = _round_up(n_nodes, 16)
    if n_pad != n_nodes:
        node = jnp.pad(node, ((0, n_pad - n_nodes), (0, 0)))

    center = center.reshape(e_pad, 1)
    neighbor = neighbor.reshape(e_pad, 1)

    grid = (e_pad // te,)

    def row_spec(cols):
        return pl.BlockSpec((te, cols), lambda i: (i, 0))

    def full_spec(shape):
        r = len(shape)
        return pl.BlockSpec(shape, lambda i, _r=r: (0,) * _r)

    out = pl.pallas_call(
        _update_edge_kernel,
        out_shape=jax.ShapeDtypeStruct((e_pad, D), jnp.float32),
        grid_spec=pltpu.PrefetchScalarGridSpec(
            num_scalar_prefetch=0,
            grid=grid,
            in_specs=[
                row_spec(1),                  # center indices (vector, VMEM)
                row_spec(1),                  # neighbor indices
                full_spec((n_pad, D)),        # node table (bf16, resident across edge tiles)
                row_spec(D),                  # hidden_features tile
                row_spec(D),                  # edge_features tile (residual input)
                row_spec(LAT),                # latents tile
                full_spec((3 * D, 2 * D)),    # w_tp
                full_spec((1, 2 * D)),        # b_tp
                full_spec((D, D)),            # w_post
                full_spec((1, D)),            # b_post
                full_spec((LAT, D)),          # w_emb (m-broadcast + C_NEW folded in)
                full_spec((1, D)),            # b_emb
                full_spec((D, D)),            # w_res (C_OLD folded in)
                full_spec((1, D)),            # b_res
            ],
            out_specs=pl.BlockSpec((te, D), lambda i: (i, 0)),
        ),
        compiler_params=pltpu.CompilerParams(
            dimension_semantics=("parallel",),      # v7x: shard edge tiles across 2 TCs
            vmem_limit_bytes=48 * 1024 * 1024,      # explicit; node table is bf16 so this
                                                    # stays well inside v7x's 64 MiB VMEM
        ),
    )(center, neighbor, node, hidden, edge, lat,
      params["w_tp"], params["b_tp"], params["w_post"], params["b_post"],
      params["w_emb"], params["b_emb"], params["w_res"], params["b_res"])
    return out[:e]


# ---------------- deterministic synthetic parameters ----------------
def init_params(key):
    ktp, kpost, kres, kemb = jax.random.split(key, 4)
    eye3 = jnp.eye(3, dtype=jnp.float32)

    # tp replacement: per-input-tensor equivariant blocks; gate columns pre-broadcast over m.
    w_tp = jnp.zeros((3 * D, 2 * D), jnp.float32)
    s_in = 1.0 / math.sqrt(3 * C0)
    tkeys = jax.random.split(ktp, 9)
    for t in range(3):                                 # [node_center, hidden, node_neighbor]
        ws = jax.random.normal(tkeys[3 * t + 0], (C0, C0), jnp.float32) * s_in  # 0e -> silu scalars
        wg = jax.random.normal(tkeys[3 * t + 1], (C0, C1), jnp.float32) * s_in  # 0e -> gates
        wv = jax.random.normal(tkeys[3 * t + 2], (C1, C1), jnp.float32) * s_in  # 1o -> 1o (per m)
        r0 = t * D
        w_tp = w_tp.at[r0:r0 + C0, 0:C0].set(ws)
        w_tp = w_tp.at[r0 + C0:r0 + D, C0:D].set(jnp.kron(eye3, wv))
        for m in range(3):
            col = D + C0 + m * C1
            w_tp = w_tp.at[r0:r0 + C0, col:col + C1].set(wg)
    b_tp = jnp.zeros((1, 2 * D), jnp.float32)

    def eq_linear(k):
        k1, k2 = jax.random.split(k)
        ws = jax.random.normal(k1, (C0, C0), jnp.float32) / math.sqrt(C0)
        wv = jax.random.normal(k2, (C1, C1), jnp.float32) / math.sqrt(C1)
        w = jnp.zeros((D, D), jnp.float32)
        w = w.at[:C0, :C0].set(ws)
        w = w.at[C0:, C0:].set(jnp.kron(eye3, wv))
        return w

    w_post = eq_linear(kpost)
    b_post = jnp.zeros((1, D), jnp.float32)    # e3nn Linear biases (scalar-only) init to zero

    # linear_res, with the C_OLD res_update coefficient folded in (exact: constant scale of a
    # linear map).  Folded BEFORE the bf16 cast so kernel and reference share identical weights.
    w_res = eq_linear(kres) * C_OLD
    b_res = jnp.zeros((1, D), jnp.float32) * C_OLD

    # edge_embed (ScalarMLPFunction, no hidden layers: single LAT->64 linear), with the
    # E3ElementLinear per-m channel broadcast AND the C_NEW res_update coefficient folded into
    # a lane-dense (LAT, 128) weight.
    w_raw = jax.random.normal(kemb, (LAT, C0 + C1), jnp.float32) / math.sqrt(LAT)
    w_emb = jnp.concatenate([w_raw[:, :C0], w_raw[:, C0:], w_raw[:, C0:], w_raw[:, C0:]],
                            axis=1) * C_NEW
    b_emb = jnp.zeros((1, D), jnp.float32) * C_NEW

    bf = jnp.bfloat16
    return dict(w_tp=w_tp.astype(bf), b_tp=b_tp,
                w_post=w_post.astype(bf), b_post=b_post,
                w_emb=w_emb.astype(bf), b_emb=b_emb,
                w_res=w_res.astype(bf), b_res=b_res)


# ---------------- pure-JAX reference (same synthetic semantics) ----------------
def reference_update_edge(params, latents, node_features, hidden_features, edge_features,
                          edge_index, edge_vector, active_edges):
    del edge_vector
    bf = jnp.bfloat16
    center = edge_index[0][active_edges]
    neighbor = edge_index[1][active_edges]
    node_bf = node_features.astype(bf)
    xc = node_bf[center]
    xh = hidden_features.astype(bf)
    xn = node_bf[neighbor]
    x_cat = jnp.concatenate([xc, xh, xn], axis=-1)
    acc = jnp.dot(x_cat, params["w_tp"], preferred_element_type=jnp.float32) + params["b_tp"]
    pre, glog = acc[:, :D], acc[:, D:]
    lane = jnp.arange(D)[None, :]
    g = jnp.where(lane < C0, pre, glog)
    gated = pre * jax.nn.sigmoid(g)
    post = jnp.dot(gated.astype(bf), params["w_post"],
                   preferred_element_type=jnp.float32) + params["b_post"]
    w_e3 = jnp.dot(latents[active_edges].astype(bf), params["w_emb"],
                   preferred_element_type=jnp.float32) + params["b_emb"]
    res = jnp.dot(edge_features.astype(bf), params["w_res"],
                  preferred_element_type=jnp.float32) + params["b_res"]
    # res_update coefficients (C_NEW / C_OLD) are pre-folded into w_emb / w_res.
    return post * w_e3 + res


# ---------------- main ----------------
if __name__ == "__main__":
    key = jax.random.PRNGKey(0)
    kp, kd = jax.random.split(key)
    params = init_params(kp)

    N_NODES, N_EDGES = 8, 16
    ks = jax.random.split(kd, 6)
    latents = jax.random.normal(ks[0], (N_EDGES, LAT), jnp.float32)
    node_features = jax.random.normal(ks[1], (N_NODES, D), jnp.float32)
    hidden_features = jax.random.normal(ks[2], (N_EDGES, D), jnp.float32)
    edge_features = jax.random.normal(ks[3], (N_EDGES, D), jnp.float32)
    edge_index = jax.random.randint(ks[4], (2, N_EDGES), 0, N_NODES, dtype=jnp.int32)
    ev = jax.random.normal(ks[5], (N_EDGES, 3), jnp.float32)
    edge_vector = ev / jnp.linalg.norm(ev, axis=-1, keepdims=True)
    active_edges = jnp.arange(N_EDGES, dtype=jnp.int32)

    out = update_edge(params, latents, node_features, hidden_features, edge_features,
                      edge_index, edge_vector, active_edges)
    out = jax.block_until_ready(out)

    ref = jax.block_until_ready(
        reference_update_edge(params, latents, node_features, hidden_features, edge_features,
                              edge_index, edge_vector, active_edges))

    assert out.shape == (N_EDGES, D)
    assert bool(jnp.all(jnp.isfinite(out)))
    max_err = float(jnp.max(jnp.abs(out - ref)))
    assert max_err < 5e-2, f"mismatch vs reference: {max_err}"
    print("KERNEL_OK")
</pallas_src>

<mosaic_0001>
module attributes {stable_mosaic.version = 11 : i64} {
  func.func @_update_edge_kernel(%arg0: i32, %arg1: memref<16x1xi32, #tpu.memory_space<vmem>>, %arg2: memref<16x1xi32, #tpu.memory_space<vmem>>, %arg3: memref<16x128xbf16, #tpu.memory_space<vmem>>, %arg4: memref<16x128xbf16, #tpu.memory_space<vmem>>, %arg5: memref<16x128xbf16, #tpu.memory_space<vmem>>, %arg6: memref<16x64xbf16, #tpu.memory_space<vmem>>, %arg7: memref<384x256xbf16, #tpu.memory_space<vmem>>, %arg8: memref<1x256xf32, #tpu.memory_space<vmem>>, %arg9: memref<128x128xbf16, #tpu.memory_space<vmem>>, %arg10: memref<1x128xf32, #tpu.memory_space<vmem>>, %arg11: memref<64x128xbf16, #tpu.memory_space<vmem>>, %arg12: memref<1x128xf32, #tpu.memory_space<vmem>>, %arg13: memref<128x128xbf16, #tpu.memory_space<vmem>>, %arg14: memref<1x128xf32, #tpu.memory_space<vmem>>, %arg15: memref<16x128xf32, #tpu.memory_space<vmem>>) attributes {dimension_semantics = [#tpu.dimension_semantics<parallel>], iteration_bounds = array<i64: 1>, scalar_prefetch = 0 : i64, scratch_operands = 0 : i64, tpu.core_type = #tpu.core_type<tc>, window_params = [{transform_indices = @transform_0, window_bounds = array<i64: 16, 1>}, {transform_indices = @transform_1, window_bounds = array<i64: 16, 1>}, {pipeline_mode = #tpu.pipeline_mode<synchronous>, transform_indices = @transform_2, window_bounds = array<i64: 16, 128>}, {transform_indices = @transform_3, window_bounds = array<i64: 16, 128>}, {transform_indices = @transform_4, window_bounds = array<i64: 16, 128>}, {transform_indices = @transform_5, window_bounds = array<i64: 16, 64>}, {pipeline_mode = #tpu.pipeline_mode<synchronous>, transform_indices = @transform_6, window_bounds = array<i64: 384, 256>}, {pipeline_mode = #tpu.pipeline_mode<synchronous>, transform_indices = @transform_7, window_bounds = array<i64: 1, 256>}, {pipeline_mode = #tpu.pipeline_mode<synchronous>, transform_indices = @transform_8, window_bounds = array<i64: 128, 128>}, {pipeline_mode = #tpu.pipeline_mode<synchronous>, transform_indices = @transform_9, window_bounds = array<i64: 1, 128>}, {pipeline_mode = #tpu.pipeline_mode<synchronous>, transform_indices = @transform_10, window_bounds = array<i64: 64, 128>}, {pipeline_mode = #tpu.pipeline_mode<synchronous>, transform_indices = @transform_11, window_bounds = array<i64: 1, 128>}, {pipeline_mode = #tpu.pipeline_mode<synchronous>, transform_indices = @transform_12, window_bounds = array<i64: 128, 128>}, {pipeline_mode = #tpu.pipeline_mode<synchronous>, transform_indices = @transform_13, window_bounds = array<i64: 1, 128>}, {transform_indices = @transform_14, window_bounds = array<i64: 16, 128>}]} {
    %c0 = arith.constant 0 : index
    %c0_0 = arith.constant 0 : index
    %0 = vector.load %arg3[%c0, %c0_0] : memref<16x128xbf16, #tpu.memory_space<vmem>>, vector<16x128xbf16>
    %1 = tpu.iota {dimensions = array<i32: 1>} : vector<16x16xi32>
    %c0_1 = arith.constant 0 : index
    %c0_2 = arith.constant 0 : index
    %2 = vector.load %arg1[%c0_1, %c0_2] : memref<16x1xi32, #tpu.memory_space<vmem>>, vector<16x1xi32>
    %3 = vector.broadcast %2 : vector<16x1xi32> to vector<16x16xi32>
    %4 = arith.cmpi eq, %1, %3 : vector<16x16xi32>
    %5 = arith.extui %4 : vector<16x16xi1> to vector<16x16xi32>
    %6 = arith.sitofp %5 : vector<16x16xi32> to vector<16x16xf32>
    %7 = arith.truncf %6 : vector<16x16xf32> to vector<16x16xbf16>
    %c0_3 = arith.constant 0 : index
    %c0_4 = arith.constant 0 : index
    %8 = vector.load %arg2[%c0_3, %c0_4] : memref<16x1xi32, #tpu.memory_space<vmem>>, vector<16x1xi32>
    %9 = vector.broadcast %8 : vector<16x1xi32> to vector<16x16xi32>
    %10 = arith.cmpi eq, %1, %9 : vector<16x16xi32>
    %11 = arith.extui %10 : vector<16x16xi1> to vector<16x16xi32>
    %12 = arith.sitofp %11 : vector<16x16xi32> to vector<16x16xf32>
    %13 = arith.truncf %12 : vector<16x16xf32> to vector<16x16xbf16>
    %cst = arith.constant dense<0.000000e+00> : vector<16x128xf32>
    %14 = tpu.matmul %7, %0, %cst {dimension_numbers = #tpu.dot_dimension_numbers<[1], [0], [0], [1], [0, 0, 1, 1], [], []>} : vector<16x16xbf16>, vector<16x128xbf16>, vector<16x128xf32> -> vector<16x128xf32>
    %15 = arith.truncf %14 : vector<16x128xf32> to vector<16x128xbf16>
    %cst_5 = arith.constant dense<0.000000e+00> : vector<16x128xf32>
    %16 = tpu.matmul %13, %0, %cst_5 {dimension_numbers = #tpu.dot_dimension_numbers<[1], [0], [0], [1], [0, 0, 1, 1], [], []>} : vector<16x16xbf16>, vector<16x128xbf16>, vector<16x128xf32> -> vector<16x128xf32>
    %17 = arith.truncf %16 : vector<16x128xf32> to vector<16x128xbf16>
    %c0_6 = arith.constant 0 : index
    %c0_7 = arith.constant 0 : index
    %18 = vector.load %arg4[%c0_6, %c0_7] : memref<16x128xbf16, #tpu.memory_space<vmem>>, vector<16x128xbf16>
    %19 = tpu.concatenate %15, %18, %17 in 1 : vector<16x128xbf16>, vector<16x128xbf16>, vector<16x128xbf16> -> vector<16x384xbf16>
    %c0_8 = arith.constant 0 : index
    %c0_9 = arith.constant 0 : index
    %20 = vector.load %arg7[%c0_8, %c0_9] : memref<384x256xbf16, #tpu.memory_space<vmem>>, vector<384x256xbf16>
    %cst_10 = arith.constant dense<0.000000e+00> : vector<16x256xf32>
    %21 = tpu.matmul %19, %20, %cst_10 {dimension_numbers = #tpu.dot_dimension_numbers<[1], [0], [0], [1], [0, 0, 1, 1], [], []>} : vector<16x384xbf16>, vector<384x256xbf16>, vector<16x256xf32> -> vector<16x256xf32>
    %c0_11 = arith.constant 0 : index
    %c0_12 = arith.constant 0 : index
    %22 = vector.load %arg8[%c0_11, %c0_12] : memref<1x256xf32, #tpu.memory_space<vmem>>, vector<1x256xf32>
    %23 = vector.broadcast %22 : vector<1x256xf32> to vector<16x256xf32>
    %24 = arith.addf %21, %23 : vector<16x256xf32>
    %25 = vector.extract_strided_slice %24 {offsets = [0, 0], sizes = [16, 128], strides = [1, 1]} : vector<16x256xf32> to vector<16x128xf32>
    %26 = vector.extract_strided_slice %24 {offsets = [0, 128], sizes = [16, 128], strides = [1, 1]} : vector<16x256xf32> to vector<16x128xf32>
    %27 = tpu.iota {dimensions = array<i32: 1>} : vector<16x128xi32>
    %c32_i32 = arith.constant 32 : i32
    %28 = vector.broadcast %c32_i32 : i32 to vector<16x128xi32>
    %29 = arith.cmpi slt, %27, %28 : vector<16x128xi32>
    %30 = arith.select %29, %25, %26 : vector<16x128xi1>, vector<16x128xf32>
    %31 = arith.negf %30 : vector<16x128xf32>
    %32 = math.exp %31 : vector<16x128xf32>
    %cst_13 = arith.constant 1.000000e+00 : f32
    %33 = vector.broadcast %cst_13 : f32 to vector<16x128xf32>
    %34 = arith.addf %33, %32 : vector<16x128xf32>
    %35 = arith.divf %33, %34 : vector<16x128xf32>
    %36 = arith.mulf %25, %35 : vector<16x128xf32>
    %37 = arith.truncf %36 : vector<16x128xf32> to vector<16x128xbf16>
    %c0_14 = arith.constant 0 : index
    %c0_15 = arith.constant 0 : index
    %38 = vector.load %arg9[%c0_14, %c0_15] : memref<128x128xbf16, #tpu.memory_space<vmem>>, vector<128x128xbf16>
    %cst_16 = arith.constant dense<0.000000e+00> : vector<16x128xf32>
    %39 = tpu.matmul %37, %38, %cst_16 {dimension_numbers = #tpu.dot_dimension_numbers<[1], [0], [0], [1], [0, 0, 1, 1], [], []>} : vector<16x128xbf16>, vector<128x128xbf16>, vector<16x128xf32> -> vector<16x128xf32>
    %c0_17 = arith.constant 0 : index
    %c0_18 = arith.constant 0 : index
    %40 = vector.load %arg10[%c0_17, %c0_18] : memref<1x128xf32, #tpu.memory_space<vmem>>, vector<1x128xf32>
    %41 = vector.broadcast %40 : vector<1x128xf32> to vector<16x128xf32>
    %42 = arith.addf %39, %41 : vector<16x128xf32>
    %c0_19 = arith.constant 0 : index
    %c0_20 = arith.constant 0 : index
    %43 = vector.load %arg6[%c0_19, %c0_20] : memref<16x64xbf16, #tpu.memory_space<vmem>>, vector<16x64xbf16>
    %c0_21 = arith.constant 0 : index
    %c0_22 = arith.constant 0 : index
    %44 = vector.load %arg11[%c0_21, %c0_22] : memref<64x128xbf16, #tpu.memory_space<vmem>>, vector<64x128xbf16>
    %cst_23 = arith.constant dense<0.000000e+00> : vector<16x128xf32>
    %45 = tpu.matmul %43, %44, %cst_23 {dimension_numbers = #tpu.dot_dimension_numbers<[1], [0], [0], [1], [0, 0, 1, 1], [], []>} : vector<16x64xbf16>, vector<64x128xbf16>, vector<16x128xf32> -> vector<16x128xf32>
    %c0_24 = arith.constant 0 : index
    %c0_25 = arith.constant 0 : index
    %46 = vector.load %arg12[%c0_24, %c0_25] : memref<1x128xf32, #tpu.memory_space<vmem>>, vector<1x128xf32>
    %47 = vector.broadcast %46 : vector<1x128xf32> to vector<16x128xf32>
    %48 = arith.addf %45, %47 : vector<16x128xf32>
    %c0_26 = arith.constant 0 : index
    %c0_27 = arith.constant 0 : index
    %49 = vector.load %arg5[%c0_26, %c0_27] : memref<16x128xbf16, #tpu.memory_space<vmem>>, vector<16x128xbf16>
    %c0_28 = arith.constant 0 : index
    %c0_29 = arith.constant 0 : index
    %50 = vector.load %arg13[%c0_28, %c0_29] : memref<128x128xbf16, #tpu.memory_space<vmem>>, vector<128x128xbf16>
    %cst_30 = arith.constant dense<0.000000e+00> : vector<16x128xf32>
    %51 = tpu.matmul %49, %50, %cst_30 {dimension_numbers = #tpu.dot_dimension_numbers<[1], [0], [0], [1], [0, 0, 1, 1], [], []>} : vector<16x128xbf16>, vector<128x128xbf16>, vector<16x128xf32> -> vector<16x128xf32>
    %c0_31 = arith.constant 0 : index
    %c0_32 = arith.constant 0 : index
    %52 = vector.load %arg14[%c0_31, %c0_32] : memref<1x128xf32, #tpu.memory_space<vmem>>, vector<1x128xf32>
    %53 = vector.broadcast %52 : vector<1x128xf32> to vector<16x128xf32>
    %54 = arith.addf %51, %53 : vector<16x128xf32>
    %55 = arith.mulf %42, %48 : vector<16x128xf32>
    %56 = arith.addf %55, %54 : vector<16x128xf32>
    %c0_33 = arith.constant 0 : index
    %c0_34 = arith.constant 0 : index
    %57 = vector.load %arg15[%c0_33, %c0_34] : memref<16x128xf32, #tpu.memory_space<vmem>>, vector<16x128xf32>
    tpu.vector_store %arg15[%c0_33, %c0_34], %56 {strides = array<i32>} : memref<16x128xf32, #tpu.memory_space<vmem>>, vector<16x128xf32>,
    return
  }
  func.func @transform_0(%arg0: i32) -> (i32, i32) {
    %c0_i32 = arith.constant 0 : i32
    %c0_i32_0 = arith.constant 0 : i32
    return %arg0, %c0_i32 : i32, i32
  }
  func.func @transform_1(%arg0: i32) -> (i32, i32) {
    %c0_i32 = arith.constant 0 : i32
    %c0_i32_0 = arith.constant 0 : i32
    return %arg0, %c0_i32 : i32, i32
  }
  func.func @transform_2(%arg0: i32) -> (i32, i32) {
    %c0_i32 = arith.constant 0 : i32
    %c0_i32_0 = arith.constant 0 : i32
    %c0_i32_1 = arith.constant 0 : i32
    return %c0_i32, %c0_i32_0 : i32, i32
  }
  func.func @transform_3(%arg0: i32) -> (i32, i32) {
    %c0_i32 = arith.constant 0 : i32
    %c0_i32_0 = arith.constant 0 : i32
    return %arg0, %c0_i32 : i32, i32
  }
  func.func @transform_4(%arg0: i32) -> (i32, i32) {
    %c0_i32 = arith.constant 0 : i32
    %c0_i32_0 = arith.constant 0 : i32
    return %arg0, %c0_i32 : i32, i32
  }
  func.func @transform_5(%arg0: i32) -> (i32, i32) {
    %c0_i32 = arith.constant 0 : i32
    %c0_i32_0 = arith.constant 0 : i32
    return %arg0, %c0_i32 : i32, i32
  }
  func.func @transform_6(%arg0: i32) -> (i32, i32) {
    %c0_i32 = arith.constant 0 : i32
    %c0_i32_0 = arith.constant 0 : i32
    %c0_i32_1 = arith.constant 0 : i32
    return %c0_i32, %c0_i32_0 : i32, i32
  }
  func.func @transform_7(%arg0: i32) -> (i32, i32) {
    %c0_i32 = arith.constant 0 : i32
    %c0_i32_0 = arith.constant 0 : i32
    %c0_i32_1 = arith.constant 0 : i32
    return %c0_i32, %c0_i32_0 : i32, i32
  }
  func.func @transform_8(%arg0: i32) -> (i32, i32) {
    %c0_i32 = arith.constant 0 : i32
    %c0_i32_0 = arith.constant 0 : i32
    %c0_i32_1 = arith.constant 0 : i32
    return %c0_i32, %c0_i32_0 : i32, i32
  }
  func.func @transform_9(%arg0: i32) -> (i32, i32) {
    %c0_i32 = arith.constant 0 : i32
    %c0_i32_0 = arith.constant 0 : i32
    %c0_i32_1 = arith.constant 0 : i32
    return %c0_i32, %c0_i32_0 : i32, i32
  }
  func.func @transform_10(%arg0: i32) -> (i32, i32) {
    %c0_i32 = arith.constant 0 : i32
    %c0_i32_0 = arith.constant 0 : i32
    %c0_i32_1 = arith.constant 0 : i32
    return %c0_i32, %c0_i32_0 : i32, i32
  }
  func.func @transform_11(%arg0: i32) -> (i32, i32) {
    %c0_i32 = arith.constant 0 : i32
    %c0_i32_0 = arith.constant 0 : i32
    %c0_i32_1 = arith.constant 0 : i32
    return %c0_i32, %c0_i32_0 : i32, i32
  }
  func.func @transform_12(%arg0: i32) -> (i32, i32) {
    %c0_i32 = arith.constant 0 : i32
    %c0_i32_0 = arith.constant 0 : i32
    %c0_i32_1 = arith.constant 0 : i32
    return %c0_i32, %c0_i32_0 : i32, i32
  }
  func.func @transform_13(%arg0: i32) -> (i32, i32) {
    %c0_i32 = arith.constant 0 : i32
    %c0_i32_0 = arith.constant 0 : i32
    %c0_i32_1 = arith.constant 0 : i32
    return %c0_i32, %c0_i32_0 : i32, i32
  }
  func.func @transform_14(%arg0: i32) -> (i32, i32) {
    %c0_i32 = arith.constant 0 : i32
    %c0_i32_0 = arith.constant 0 : i32
    return %arg0, %c0_i32 : i32, i32
  }
}

</mosaic_0001>

<bundles_post_ra>
// kernel: tpu_custom_call.1
= control target key start
LH: loop header
LB: loop body
LE: loop exit
PB: predicated region body
PF: predicated region fallthrough
CT: control target
= control target key end

     0   :  { %19 = vsyncpa [#allocation3], 0  ;;  %s1641_s0 = inlined_call_operand.vmem [shape: s32[16,1], index: 0, kind: input, shape index: {}]   ;;  %s1642_s1 = inlined_call_operand.vmem [shape: s32[16,1], index: 1, kind: input, shape index: {}]   ;;  %s1643_s2 = inlined_call_operand.vmem [shape: bf16[16,128], index: 2, kind: input, shape index: {}]   ;;  %s1644_s3 = inlined_call_operand.vmem [shape: bf16[16,128], index: 3, kind: input, shape index: {}]   ;;  %s1645_s4 = inlined_call_operand.hbm [shape: bf16[16,128], index: 4, kind: input, shape index: {}]   ;;  %s1646_s5 = inlined_call_operand.hbm [shape: bf16[16,64], index: 5, kind: input, shape index: {}]   ;;  %s1647_s6 = inlined_call_operand.hbm [shape: bf16[384,256], index: 6, kind: input, shape index: {}]   ;;  %s1648_s7 = inlined_call_operand.vmem [shape: f32[1,256], index: 7, kind: input, shape index: {}]   ;;  %s1649_s8 = inlined_call_operand.hbm [shape: bf16[128,128], index: 8, kind: input, shape index: {}]   ;;  %s1650_s9 = inlined_call_operand.vmem [shape: f32[1,128], index: 9, kind: input, shape index: {}]   ;;  %s1651_s10 = inlined_call_operand.vmem [shape: bf16[64,128], index: 10, kind: input, shape index: {}]   ;;  %s1652_s11 = inlined_call_operand.vmem [shape: f32[1,128], index: 11, kind: input, shape index: {}]   ;;  %s1653_s12 = inlined_call_operand.hbm [shape: bf16[128,128], index: 12, kind: input, shape index: {}]   ;;  %s1654_s13 = inlined_call_operand.vmem [shape: f32[1,128], index: 13, kind: input, shape index: {}]   ;;  %s1655_s14 = inlined_call_operand.hbm [shape: f32[16,128], index: 14, kind: output, shape index: {}]  }
   0x1   :  { %20 = vsyncpa [#allocation6], 0 }
   0x2   :  { %21 = vsyncpa [#allocation9], 0 }
   0x3   :  { %22 = vsyncpa [#allocation4], 0  ;;  %s1430_s29 = smov [#allocation5]   ;;  %s1431_s15 = smov [#allocation8]  }
   0x4   :  { %s48_s30 = sshll.u32 %s1430_s29, 4  ;;  %s74_s16 = sshll.u32 %s1431_s15, 4  ;;  %s49_s30 = int_to_ptr.vmem [resolvable:$true] %s48_s30  ;;  %s75_s16 = int_to_ptr.vmem [resolvable:$true] %s74_s16 }
   0x5   :  { %s1310_s17 = scalar_lea.vmem %s49_s30, 128  ;;  %p1315_p1 = scmp.lt.s32.totalorder %s49_s30, %s49_s30 }
   0x6   :  { %p1311_p0 = scmp.ne.s32.totalorder %s49_s30, %s1310_s17  ;;  %p1316_p2 = scmp.lt.s32.totalorder %s1310_s17, %s1310_s17 }
   0x8   :  { %p1317_p3 = por %p1316_p2, %p1315_p1 }
   0xa   :  { %p1318_p4 = pnand %p1317_p3, %p1311_p0 }
   0xc   :  { %1321 = shalt.err (!%p1318_p4)
}
   0xd   :  { %s1432_s18 = smov 64   ;;  %s1433_s19 = smov 4  }
   0xe   :  { %54 = dma.hbm_to_vmem [thread:$0]  %s1646_s5, 128, %s49_s30, [#allocation6], %s1432_s18, %s1432_s18, %s1433_s19  }
   0xf   :  { %s1330_s22 = scalar_lea.vmem %s75_s16, 1024  ;;  %p1335_p6 = scmp.lt.s32.totalorder %s75_s16, %s75_s16 }
  0x10   :  { %p1331_p5 = scmp.ne.s32.totalorder %s75_s16, %s1330_s22  ;;  %p1336_p7 = scmp.lt.s32.totalorder %s1330_s22, %s1330_s22 }
  0x12   :  { %p1337_p8 = por %p1336_p7, %p1335_p6 }
  0x14   :  { %p1338_p9 = pnand %p1337_p8, %p1331_p5 }
  0x16   :  { %1341 = shalt.err (!%p1338_p9)
}
  0x17   :  { %80 = dma.hbm_to_vmem [thread:$0]  %s1649_s8, 1024, %s75_s16, [#allocation9], %s1432_s18, %s1432_s18, %s1433_s19  }
  0x18   :  { %s1434_s25 = smov [#allocation2]   ;;  %s1435_s27 = smov [#allocation7]  }
  0x19   :  { %s36_s26 = sshll.u32 %s1434_s25, 4  ;;  %s60_s28 = sshll.u32 %s1435_s27, 4  ;;  %s37_s26 = int_to_ptr.vmem [resolvable:$true] %s36_s26  ;;  %s61_s28 = int_to_ptr.vmem [resolvable:$true] %s60_s28 }
  0x1a   :  { %s1350_s5 = scalar_lea.vmem %s37_s26, 128  ;;  %p1355_p11 = scmp.lt.s32.totalorder %s37_s26, %s37_s26 }
  0x1b   :  { %p1351_p10 = scmp.ne.s32.totalorder %s37_s26, %s1350_s5  ;;  %p1356_p12 = scmp.lt.s32.totalorder %s1350_s5, %s1350_s5 }
  0x1d   :  { %p1357_p13 = por %p1356_p12, %p1355_p11 }
  0x1f   :  { %p1358_p0 = pnand %p1357_p13, %p1351_p10 }
  0x21   :  { %1361 = shalt.err (!%p1358_p0)
}
  0x22   :  { %42 = dma.hbm_to_vmem [thread:$0]  %s1645_s4, 128, %s37_s26, [#allocation3], %s1432_s18, %s1432_s18, %s1433_s19  }
  0x23   :  { %s1370_s8 = scalar_lea.vmem %s61_s28, 6144  ;;  %p1375_p2 = scmp.lt.s32.totalorder %s61_s28, %s61_s28 }
  0x24   :  { %p1371_p1 = scmp.ne.s32.totalorder %s61_s28, %s1370_s8  ;;  %p1376_p3 = scmp.lt.s32.totalorder %s1370_s8, %s1370_s8 }
  0x26   :  { %p1377_p4 = por %p1376_p3, %p1375_p2 }
  0x28   :  { %p1378_p5 = pnand %p1377_p4, %p1371_p1 }
  0x2a   :  { %1381 = shalt.err (!%p1378_p5)
}
  0x2b   :  { %s1436_s15 = smov 128   ;;  %s1437_s16 = smov 8  }
  0x2c   :  { %66 = dma.hbm_to_vmem [thread:$0]  %s1647_s6, 6144, %s61_s28, [#allocation6], %s1436_s15, %s1436_s15, %s1437_s16  }
  0x2d   :  { %s1438_s21 = smov [#allocation10]  }
  0x2e   :  { %s92_s22 = sshll.u32 %s1438_s21, 4  ;;  %s93_s22 = int_to_ptr.vmem [resolvable:$true] %s92_s22 }
  0x2f   :  { %s1390_s4 = scalar_lea.vmem %s93_s22, 1024  ;;  %p1395_p7 = scmp.lt.s32.totalorder %s93_s22, %s93_s22 }
  0x30   :  { %p1391_p6 = scmp.ne.s32.totalorder %s93_s22, %s1390_s4  ;;  %p1396_p8 = scmp.lt.s32.totalorder %s1390_s4, %s1390_s4 }
  0x32   :  { %p1397_p9 = por %p1396_p8, %p1395_p7 }
  0x34   :  { %p1398_p10 = pnand %p1397_p9, %p1391_p6 }
  0x36   :  { %1401 = shalt.err (!%p1398_p10)
}
  0x37   :  { %98 = dma.hbm_to_vmem [thread:$0]  %s1653_s12, 1024, %s93_s22, [#allocation9], %s1432_s18, %s1432_s18, %s1433_s19  }
  0x38   :  { %1422 = dma.done.wait [#allocation3], 128  }
  0x39   :  { %1423 = vsyncadd [#allocation3], 4294967168 }
  0x3a   :  { %1424 = dma.done.wait [#allocation6], 6272  }
  0x3b   :  { %1425 = vsyncadd [#allocation6], 4294961024 }
  0x3c   :  { %1426 = dma.done.wait [#allocation9], 2048  }
  0x3d   :  { %1427 = vsyncadd [#allocation9], 4294965248  ;;  %v1439_v0 = vmov 0   ;;  %v1440_v1 = vmov 0.0   ;;  %v121_v2 = vld [vmem:[%s1641_s0] sm:$0xff]  ;;  %v122_v4 = vld [vmem:[%s1641_s0 + $0x8] sm:$0xff]  ;;  %v119_v16 = vlaneseq }
  0x3e   :  { %1196 = vset.pattern.permute.xlu0 %v1439_v0  ;;  %1197 = vset.pattern.permute.xlu1 %v1439_v0  ;;  %v136_v3 = vld [vmem:[%s1642_s1] sm:$0xff]  ;;  %v137_v5 = vld [vmem:[%s1642_s1 + $0x8] sm:$0xff]  ;;  %vm1441_vm0 = vmmov 0   ;;  %vm157_vm3 = vcmask 130048   ;;  %vm818_vm6 = vcmask 523264   ;;  %s1442_s27 = smov [#allocation11]  }
  0x3f   :  { %1119 = vmatprep.subr.bf16.mxu0 %v1440_v1  ;;  %631 = vmatprep.mubr.bf16.mxu1 %v1439_v0  ;;  %v1198_v6 = vld [vmem:[%s1643_s2] sm:$0xff]   ;;  %v1232_v7 = vld [vmem:[#allocation7 + $0x174] ss:$8 sps:$4 sm:$0xff]   ;;  %v1234_v8 = vld [vmem:[#allocation7 + $0x170] ss:$8 sps:$4 sm:$0xff]   ;;  %v1568_v17 = vand.u32 127, %v119_v16 }
  0x40   :  { %124 = vperm.xlu0 %1196, %v121_v2   ;;  %139 = vperm.xlu1 %1197, %v136_v3   ;;  %v1238_v9 = vld [vmem:[#allocation7 + $0x164] ss:$8 sps:$4 sm:$0xff]   ;;  %v1240_v10 = vld [vmem:[#allocation7 + $0x160] ss:$8 sps:$4 sm:$0xff]   ;;  %v1244_v11 = vld [vmem:[#allocation7 + $0x154] ss:$8 sps:$4 sm:$0xff]  }
  0x41   :  { %1120 = vmatpush3.bf16.msra.mxu0 %v1198_v6  ;;  %1121 = vmatprep.mubr.msk.bf16.mxu0 %vm1441_vm0, %v1440_v1  ;;  %v1246_v12 = vld [vmem:[#allocation7 + $0x150] ss:$8 sps:$4 sm:$0xff]   ;;  %v1250_v13 = vld [vmem:[#allocation7 + $0x144] ss:$8 sps:$4 sm:$0xff]   ;;  %v1252_v14 = vld [vmem:[#allocation7 + $0x140] ss:$8 sps:$4 sm:$0xff]  }
  0x42   :  { %1125 = vmatprep.subr.bf16.mxu0 %v1440_v1  ;;  %599 = vmatprep.subr.bf16.mxu1 %v1232_v7  ;;  %v1256_v15 = vld [vmem:[#allocation7 + $0x134] ss:$8 sps:$4 sm:$0xff]   ;;  %v1199_v28 = vld [vmem:[#allocation7 + $0x70] ss:$8 sps:$4 sm:$0xff]   ;;  %v1204_v30 = vld [vmem:[#allocation7 + $0x64] ss:$8 sps:$4 sm:$0xff]  }
  0x43   :  { %600 = vmatpush1.bf16.msra.mxu1 %v1234_v8  ;;  %v1201_v25 = vld [vmem:[#allocation7 + $0x74] ss:$8 sps:$4 sm:$0xff]   ;;  %v1202_v31 = vld [vmem:[#allocation7 + $0x60] ss:$8 sps:$4 sm:$0xff]   ;;  %v1205_v33 = vld [vmem:[#allocation7 + $0x50] ss:$8 sps:$4 sm:$0xff]  }
  0x44   :  { %127 = vperm.xlu0 %1196, %v122_v4   ;;  %142 = vperm.xlu1 %1197, %v137_v5   ;;  %v1207_v32 = vld [vmem:[#allocation7 + $0x54] ss:$8 sps:$4 sm:$0xff]   ;;  %v1210_v34 = vld [vmem:[#allocation7 + $0x44] ss:$8 sps:$4 sm:$0xff]   ;;  %v1208_v35 = vld [vmem:[#allocation7 + $0x40] ss:$8 sps:$4 sm:$0xff]  }
  0x45   :  { %601 = vmatprep.subr.bf16.mxu1 %v1238_v9  ;;  %v1213_v36 = vld [vmem:[#allocation7 + $0x34] ss:$8 sps:$4 sm:$0xff]   ;;  %v1211_v37 = vld [vmem:[#allocation7 + $0x30] ss:$8 sps:$4 sm:$0xff]   ;;  %v1216_v38 = vld [vmem:[#allocation7 + $0x24] ss:$8 sps:$4 sm:$0xff]  }
  0x46   :  { %v1214_v39 = vld [vmem:[#allocation7 + $0x20] ss:$8 sps:$4 sm:$0xff]   ;;  %v1219_v40 = vld [vmem:[#allocation7 + $0x14] ss:$8 sps:$4 sm:$0xff]   ;;  %v1217_v41 = vld [vmem:[#allocation7 + $0x10] ss:$8 sps:$4 sm:$0xff]  }
  0x47   :  { %602 = vmatpush1.bf16.msra.mxu1 %v1240_v10  ;;  %v1222_v42 = vld [vmem:[#allocation7 + $0x4] ss:$8 sps:$4 sm:$0xff]   ;;  %v1220_v43 = vld [vmem:[#allocation7] ss:$8 sps:$4 sm:$0xff]   ;;  %v1225_v44 = vld [vmem:[#allocation7 + $0xf4] ss:$8 sps:$4 sm:$0xff]  }
  0x48   :  { %603 = vmatprep.subr.bf16.mxu1 %v1244_v11  ;;  %v1223_v45 = vld [vmem:[#allocation7 + $0xf0] ss:$8 sps:$4 sm:$0xff]   ;;  %v1228_v46 = vld [vmem:[#allocation7 + $0xe4] ss:$8 sps:$4 sm:$0xff]   ;;  %v1226_v47 = vld [vmem:[#allocation7 + $0xe0] ss:$8 sps:$4 sm:$0xff]  }
  0x49   :  { %v1231_v48 = vld [vmem:[#allocation7 + $0xd4] ss:$8 sps:$4 sm:$0xff]   ;;  %v1229_v49 = vld [vmem:[#allocation7 + $0xd0] ss:$8 sps:$4 sm:$0xff]   ;;  %v1237_v50 = vld [vmem:[#allocation7 + $0xc4] ss:$8 sps:$4 sm:$0xff]  }
  0x4a   :  { %v1235_v51 = vld [vmem:[#allocation7 + $0xc0] ss:$8 sps:$4 sm:$0xff]   ;;  %v1243_v52 = vld [vmem:[#allocation7 + $0xb4] ss:$8 sps:$4 sm:$0xff]   ;;  %v1241_v53 = vld [vmem:[#allocation7 + $0xb0] ss:$8 sps:$4 sm:$0xff]  }
  0x4b   :  { %604 = vmatpush1.bf16.msra.mxu1 %v1246_v12  ;;  %v1249_v54 = vld [vmem:[#allocation7 + $0xa4] ss:$8 sps:$4 sm:$0xff]   ;;  %v1247_v55 = vld [vmem:[#allocation7 + $0xa0] ss:$8 sps:$4 sm:$0xff]   ;;  %v1255_v56 = vld [vmem:[#allocation7 + $0x94] ss:$8 sps:$4 sm:$0xff]  }
  0x4c   :  { %605 = vmatprep.subr.bf16.mxu1 %v1250_v13  ;;  %v1253_v57 = vld [vmem:[#allocation7 + $0x90] ss:$8 sps:$4 sm:$0xff]   ;;  %v1261_v59 = vld [vmem:[#allocation7 + $0x84] ss:$8 sps:$4 sm:$0xff]   ;;  %v1259_v61 = vld [vmem:[#allocation7 + $0x80] ss:$8 sps:$4 sm:$0xff]  }
  0x4d   :  { %v1258_v58 = vld [vmem:[#allocation7 + $0x130] ss:$8 sps:$4 sm:$0xff]   ;;  %v1262_v60 = vld [vmem:[#allocation7 + $0x124] ss:$8 sps:$4 sm:$0xff]   ;;  %v1264_v62 = vld [vmem:[#allocation7 + $0x120] ss:$8 sps:$4 sm:$0xff]  }
  0x4e   :  { %v1265_v63 = vld [vmem:[%s1644_s3] sm:$0xff]   ;;  %v1266_v0 = vld [vmem:[#allocation7 + $0x114] ss:$8 sps:$4 sm:$0xff]   ;;  %v1268_v2 = vld [vmem:[#allocation7 + $0x110] ss:$8 sps:$4 sm:$0xff]   ;;  %vm642_vm7 = vcmp.lt.s32.totalorder %v1568_v17, 32 }
  0x4f   :  { %606 = vmatpush1.bf16.msra.mxu1 %v1252_v14  ;;  %v1269_v3 = vld [vmem:[#allocation7 + $0x104] ss:$8 sps:$4 sm:$0xff]   ;;  %v1271_v4 = vld [vmem:[#allocation7 + $0x100] ss:$8 sps:$4 sm:$0xff]  }
  0x50   :  { %607 = vmatprep.subr.bf16.mxu1 %v1256_v15  ;;  %v1272_v15 = vld [vmem:[#allocation8 + $0x38] sm:$0xff]  }
  0x53   :  { %608 = vmatpush1.bf16.msra.mxu1 %v1258_v58 }
  0x54   :  { %609 = vmatprep.subr.bf16.mxu1 %v1262_v60 }
  0x57   :  { %610 = vmatpush1.bf16.msra.mxu1 %v1264_v62  ;;  %v1285_v62 = vld [vmem:[#allocation10 + $0x38] sm:$0xff]  }
  0x58   :  { %611 = vmatprep.subr.bf16.mxu1 %v1266_v0  ;;  %v1286_v0 = vld [vmem:[#allocation10 + $0x30] sm:$0xff]  }
  0x5b   :  { %612 = vmatpush1.bf16.msra.mxu1 %v1268_v2  ;;  %v1287_v2 = vld [vmem:[#allocation10 + $0x28] sm:$0xff]  }
  0x5c   :  { %613 = vmatprep.subr.bf16.mxu1 %v1269_v3  ;;  %v1288_v3 = vld [vmem:[#allocation10 + $0x20] sm:$0xff]  }
  0x5f   :  { %614 = vmatpush1.bf16.msra.mxu1 %v1271_v4  ;;  %v1289_v4 = vld [vmem:[#allocation10 + $0x18] sm:$0xff]  }
  0x60   :  { %1131 = vmatprep.subr.bf16.mxu1 %v1440_v1 }
  0xbb   :  { %v125_v18 = vpop.permute.xlu0 %124  ;;  %v140_v19 = vpop.permute.xlu1 %139 }
  0xbc   :  { %vm129_vm1 = vcmp.eq.s32.totalorder %v1568_v17, %v125_v18  ;;  %vm144_vm4 = vcmp.eq.s32.totalorder %v1568_v17, %v140_v19  ;;  %v1273_v18 = vld [vmem:[#allocation8 + $0x30] sm:$0xff]   ;;  %v1274_v19 = vld [vmem:[#allocation8 + $0x28] sm:$0xff]  }
  0xbd   :  { %v1008_v21 = vsel %vm129_vm1, 1.0, %v1440_v1  ;;  %v1010_v26 = vsel %vm144_vm4, 1.0, %v1440_v1 }
  0xbf   :  { %v128_v20 = vpop.permute.xlu0 %127  ;;  %v143_v23 = vpop.permute.xlu1 %142 }
  0xc0   :  { %vm130_vm2 = vcmp.eq.s32.totalorder %v1568_v17, %v128_v20  ;;  %vm145_vm5 = vcmp.eq.s32.totalorder %v1568_v17, %v143_v23  ;;  %v1275_v20 = vld [vmem:[#allocation8 + $0x20] sm:$0xff]   ;;  %v1278_v23 = vld [vmem:[#allocation8 + $0x10] sm:$0xff]  }
  0xc1   :  { %v1009_v22 = vsel %vm130_vm2, 1.0, %v1440_v1  ;;  %v1011_v27 = vsel %vm145_vm5, 1.0, %v1440_v1 }
  0xc2   :  { %v135_v24 = vpack.c.bf16 %v1009_v22, %v1008_v21  ;;  %v150_v29 = vpack.c.bf16 %v1011_v27, %v1010_v26  ;;  %v1276_v21 = vld [vmem:[#allocation8 + $0x18] sm:$0xff]   ;;  %v1277_v22 = vld [vmem:[%s1651_s10 + $0x18] sm:$0xff]   ;;  %v1281_v26 = vld [vmem:[%s1651_s10 + $0x8] sm:$0xff]  }
  0xc3   :  { %v1282_v27 = vld [vmem:[#allocation8] sm:$0xff]  }
  0xc4   :  { %1122 = vmatmul.mubr.msk.bf16.vlgmr.msra.gmra.mxu0 %vm157_vm3, %v135_v24  ;;  %v1279_v24 = vld [vmem:[%s1651_s10 + $0x10] sm:$0xff]  }
  0xc5   :  { %1126 = vmatpush3.bf16.msra.mxu0 %v1198_v6  ;;  %1127 = vmatprep.mubr.msk.bf16.mxu0 %vm1441_vm0, %v1440_v1 }
  0xc6   :  { %556 = vmatprep.subr.bf16.mxu0 %v1201_v25  ;;  %v1280_v25 = vld [vmem:[#allocation8 + $0x8] sm:$0xff]  }
  0xcc   :  { %1128 = vmatmul.mubr.msk.bf16.vlgmr.msra.gmra.mxu0 %vm157_vm3, %v150_v29  ;;  %v1284_v29 = vld [vmem:[#allocation5] sm:$0xff]  }
  0xcd   :  { %557 = vmatpush1.bf16.msra.mxu0 %v1199_v28  ;;  %588 = vmatprep.mubr.bf16.mxu0 %v1265_v63  ;;  %v1283_v28 = vld [vmem:[%s1651_s10] sm:$0xff]  }
  0xce   :  { %558 = vmatprep.subr.bf16.mxu0 %v1204_v30  ;;  %v307_v30 = vshrl.u32 %v119_v16, 7 }
  0xd1   :  { %559 = vmatpush1.bf16.msra.mxu0 %v1202_v31 }
  0xd2   :  { %560 = vmatprep.subr.bf16.mxu0 %v1207_v32  ;;  %v308_v32 = vsub.s32 0, %v307_v30 }
  0xd5   :  { %561 = vmatpush1.bf16.msra.mxu0 %v1205_v33  ;;  %v312_v33 = vsub.s32 1, %v307_v30 }
  0xd6   :  { %562 = vmatprep.subr.bf16.mxu0 %v1210_v34  ;;  %v304_v34 = vld [vmem:[%s1648_s7] sm:$0x3] }
  0xd9   :  { %563 = vmatpush1.bf16.msra.mxu0 %v1208_v35 }
  0xda   :  { %564 = vmatprep.subr.bf16.mxu0 %v1213_v36  ;;  %v309_v36 = vrot.slane %v304_v34, %v308_v32 }
  0xdd   :  { %565 = vmatpush1.bf16.msra.mxu0 %v1211_v37  ;;  %v313_v37 = vrot.slane %v304_v34, %v312_v33 }
  0xde   :  { %566 = vmatprep.subr.bf16.mxu0 %v1216_v38 }
  0xe1   :  { %567 = vmatpush1.bf16.msra.mxu0 %v1214_v39 }
  0xe2   :  { %568 = vmatprep.subr.bf16.mxu0 %v1219_v40 }
  0xe5   :  { %569 = vmatpush1.bf16.msra.mxu0 %v1217_v41 }
  0xe6   :  { %570 = vmatprep.subr.bf16.mxu0 %v1222_v42 }
  0xe9   :  { %571 = vmatpush1.bf16.msra.mxu0 %v1220_v43 }
  0xea   :  { %572 = vmatprep.subr.bf16.mxu0 %v1225_v44 }
  0xed   :  { %573 = vmatpush2.bf16.msra.mxu0 %v1223_v45 }
  0xee   :  { %574 = vmatprep.subr.bf16.mxu0 %v1228_v46 }
  0xf1   :  { %575 = vmatpush2.bf16.msra.mxu0 %v1226_v47 }
  0xf2   :  { %576 = vmatprep.subr.bf16.mxu0 %v1231_v48 }
  0xf5   :  { %577 = vmatpush2.bf16.msra.mxu0 %v1229_v49 }
  0xf6   :  { %578 = vmatprep.subr.bf16.mxu0 %v1237_v50 }
  0xf9   :  { %579 = vmatpush2.bf16.msra.mxu0 %v1235_v51 }
  0xfa   :  { %580 = vmatprep.subr.bf16.mxu0 %v1243_v52 }
  0xfd   :  { %581 = vmatpush2.bf16.msra.mxu0 %v1241_v53 }
  0xfe   :  { %582 = vmatprep.subr.bf16.mxu0 %v1249_v54 }
 0x101   :  { %583 = vmatpush2.bf16.msra.mxu0 %v1247_v55 }
 0x102   :  { %584 = vmatprep.subr.bf16.mxu0 %v1255_v56 }
 0x105   :  { %585 = vmatpush2.bf16.msra.mxu0 %v1253_v57 }
 0x106   :  { %586 = vmatprep.subr.bf16.mxu0 %v1261_v59 }
 0x109   :  { %587 = vmatpush2.bf16.msra.mxu0 %v1259_v61 }
 0x10a   :  { %1151 = vmatprep.subr.bf16.mxu0 %v1440_v1 }
 0x184   :  { %v195_v5 = vpop.f32.mrf.mxu0 }
 0x186   :  { %v1123_v6 = vpop.f32.mrf.mxu0 }
 0x187   :  { %v1291_v6 = vld [vmem:[#allocation10 + $0x8] sm:$0xff]  }
 0x188   :  { %v198_v7 = vpop.f32.mrf.mxu0 }
 0x189   :  { %v202_v8 = vpack.c.bf16 %v198_v7, %v195_v5  ;;  %v1290_v5 = vld [vmem:[#allocation10 + $0x10] sm:$0xff]   ;;  %v1292_v7 = vld [vmem:[#allocation10] sm:$0xff]  }
 0x18a   :  { %v1124_v9 = vpop.f32.mrf.mxu0 }
 0x18b   :  { %589 = vmatmul.mubr.bf16.vlgmr.msra.gmra.mxu0 %v202_v8  ;;  %v1293_v8 = vld [vmem:[#allocation2] sm:$0xff]  }
 0x18c   :  { %v240_v10 = vpop.f32.mrf.mxu0  ;;  %1159 = vmatprep.mubr.msk.bf16.mxu0 %vm1441_vm0, %v1440_v1  ;;  %1152 = vmatpush3.bf16.msra.mxu0 %v1277_v22  ;;  %v1082_v22 = vld [vmem:[%s1654_s13] ss:$0 sm:$0xff] }
 0x18d   :  { %1153 = vmatprep.subr.bf16.mxu0 %v1440_v1 }
 0x18e   :  { %v1129_v11 = vpop.f32.mrf.mxu0 }
 0x190   :  { %v243_v12 = vpop.f32.mrf.mxu0  ;;  %1154 = vmatpush3.bf16.msra.mxu0 %v1279_v24 }
 0x191   :  { %v247_v13 = vpack.c.bf16 %v243_v12, %v240_v10  ;;  %1155 = vmatprep.subr.bf16.mxu0 %v1440_v1 }
 0x192   :  { %v1130_v14 = vpop.f32.mrf.mxu0 }
 0x193   :  { %632 = vmatmul.mubr.bf16.vlgmr.msra.gmra.mxu1 %v247_v13 }
 0x194   :  { %1147 = vmatprep.mubr.msk.bf16.mxu1 %vm1441_vm0, %v1440_v1  ;;  %1132 = vmatpush3.bf16.msra.mxu1 %v1272_v15 }
 0x195   :  { %1133 = vmatprep.subr.bf16.mxu1 %v1440_v1  ;;  %1156 = vmatpush3.bf16.msra.mxu0 %v1281_v26 }
 0x196   :  { %1157 = vmatprep.subr.bf16.mxu0 %v1440_v1 }
 0x198   :  { %1134 = vmatpush3.bf16.msra.mxu1 %v1273_v18 }
 0x199   :  { %1135 = vmatprep.subr.bf16.mxu1 %v1440_v1  ;;  %1158 = vmatpush3.bf16.msra.mxu0 %v1283_v28 }
 0x19c   :  { %1136 = vmatpush3.bf16.msra.mxu1 %v1274_v19  ;;  %1160 = vmatmul.mubr.msk.bf16.vlgmr.msra.gmra.mxu0 %vm818_vm6, %v1284_v29  ;;  %v1066_v19 = vld [vmem:[%s1650_s9] ss:$0 sm:$0xff]  ;;  %s994_s9 = sshll.u32 %s1442_s27, 4  ;;  %s995_s9 = int_to_ptr.vmem [resolvable:$true] %s994_s9 }
 0x19d   :  { %1137 = vmatprep.subr.bf16.mxu1 %v1440_v1  ;;  %p1407_p12 = scmp.lt.s32.totalorder %s995_s9, %s995_s9 }
 0x1a0   :  { %1138 = vmatpush3.bf16.msra.mxu1 %v1275_v20  ;;  %v1075_v20 = vld [vmem:[%s1652_s11] ss:$0 sm:$0xff]  ;;  %s1402_s11 = scalar_lea.vmem %s995_s9, 256 }
 0x1a1   :  { %1139 = vmatprep.subr.bf16.mxu1 %v1440_v1  ;;  %p1403_p11 = scmp.ne.s32.totalorder %s995_s9, %s1402_s11  ;;  %p1408_p13 = scmp.lt.s32.totalorder %s1402_s11, %s1402_s11 }
 0x1a3   :  { %p1409_p0 = por %p1408_p13, %p1407_p12 }
 0x1a4   :  { %1140 = vmatpush3.bf16.msra.mxu1 %v1276_v21 }
 0x1a5   :  { %1141 = vmatprep.subr.bf16.mxu1 %v1440_v1  ;;  %p1410_p1 = pnand %p1409_p0, %p1403_p11 }
 0x1a8   :  { %1142 = vmatpush3.bf16.msra.mxu1 %v1278_v23 }
 0x1a9   :  { %1143 = vmatprep.subr.bf16.mxu1 %v1440_v1 }
 0x1ac   :  { %1144 = vmatpush3.bf16.msra.mxu1 %v1280_v25 }
 0x1ad   :  { %1145 = vmatprep.subr.bf16.mxu1 %v1440_v1 }
 0x1b0   :  { %1146 = vmatpush3.bf16.msra.mxu1 %v1282_v27 }
 0x1b1   :  { %1163 = vmatprep.subr.bf16.mxu1 %v1440_v1 }
 0x24b   :  { %v590_v31 = vpop.f32.mrf.mxu0 }
 0x24c   :  { %v591_v40 = vadd.f32 %v590_v31, %v309_v36 }
 0x24d   :  { %v592_v35 = vpop.f32.mrf.mxu0 }
 0x24e   :  { %v593_v41 = vadd.f32 %v592_v35, %v313_v37 }
 0x24f   :  { %v594_v38 = vpop.f32.mrf.mxu0 }
 0x250   :  { %v595_v46 = vadd.f32 %v594_v38, %v309_v36 }
 0x251   :  { %v596_v42 = vpop.f32.mrf.mxu0 }
 0x252   :  { %v597_v47 = vadd.f32 %v596_v42, %v313_v37 }
 0x253   :  { %v633_v39 = vpop.f32.mrf.mxu1 }
 0x254   :  { %v634_v44 = vadd.f32 %v633_v39, %v591_v40 }
 0x255   :  { %v635_v43 = vpop.f32.mrf.mxu1 }
 0x256   :  { %v636_v16 = vadd.f32 %v635_v43, %v593_v41 }
 0x257   :  { %v637_v45 = vpop.f32.mrf.mxu1 }
 0x258   :  { %v643_v48 = vsel %vm642_vm7, %v634_v44, %v636_v16  ;;  %v638_v51 = vadd.f32 %v637_v45, %v595_v46 }
 0x259   :  { %v1064_v49 = vmul.f32 -1.442695, %v643_v48  ;;  %v639_v50 = vpop.f32.mrf.mxu1 }
 0x25a   :  { %v640_v52 = vadd.f32 %v639_v50, %v597_v47 }
 0x25b   :  { %1294 = vpow2.f32 %v1064_v49 }
 0x25c   :  { %v644_v53 = vsel %vm642_vm7, %v638_v51, %v640_v52  ;;  %v856_v9 = vpop.f32.mrf.mxu0 }
 0x25d   :  { %v1065_v54 = vmul.f32 -1.442695, %v644_v53  ;;  %v857_v21 = vadd.f32 %v1075_v20, %v856_v9 }
 0x25e   :  { %v1161_v10 = vpop.f32.mrf.mxu0 }
 0x25f   :  { %1296 = vpow2.f32 %v1065_v54 }
 0x260   :  { %v859_v11 = vpop.f32.mrf.mxu0 }
 0x261   :  { %v860_v26 = vadd.f32 %v1075_v20, %v859_v11 }
 0x262   :  { %v1162_v12 = vpop.f32.mrf.mxu0 }
 0x268   :  { %v1295_v55 = vpop.eup %1294 }
 0x269   :  { %v651_v56 = vadd.f32 1.0, %v1295_v55 }
 0x26b   :  { %1298 = vrcp.f32 %v651_v56 }
 0x26c   :  { %v1297_v57 = vpop.eup %1296 }
 0x26d   :  { %v652_v58 = vadd.f32 1.0, %v1297_v57 }
 0x26f   :  { %1300 = vrcp.f32 %v652_v58 }
 0x278   :  { %v1299_v17 = vpop.eup %1298 }
 0x279   :  { %v657_v60 = vmul.f32 %v1299_v17, %v634_v44 }
 0x27c   :  { %v1301_v59 = vpop.eup %1300 }
 0x27d   :  { %v658_v61 = vmul.f32 %v1301_v59, %v638_v51 }
 0x27f   :  { %v659_v63 = vpack.c.bf16 %v658_v61, %v657_v60 }
 0x281   :  { %1148 = vmatmul.mubr.bf16.vlgmr.msra.gmra.mxu1 %v659_v63 }
 0x282   :  { %1164 = vmatpush3.bf16.msra.mxu1 %v1285_v62  ;;  %1179 = vmatprep.mubr.msk.bf16.mxu1 %vm1441_vm0, %v1440_v1 }
 0x283   :  { %1165 = vmatprep.subr.bf16.mxu1 %v1440_v1 }
 0x286   :  { %1166 = vmatpush3.bf16.msra.mxu1 %v1286_v0 }
 0x287   :  { %1167 = vmatprep.subr.bf16.mxu1 %v1440_v1 }
 0x28a   :  { %1168 = vmatpush3.bf16.msra.mxu1 %v1287_v2 }
 0x28b   :  { %1169 = vmatprep.subr.bf16.mxu1 %v1440_v1 }
 0x28e   :  { %1170 = vmatpush3.bf16.msra.mxu1 %v1288_v3 }
 0x28f   :  { %1171 = vmatprep.subr.bf16.mxu1 %v1440_v1 }
 0x292   :  { %1172 = vmatpush3.bf16.msra.mxu1 %v1289_v4 }
 0x293   :  { %1173 = vmatprep.subr.bf16.mxu1 %v1440_v1 }
 0x296   :  { %1174 = vmatpush3.bf16.msra.mxu1 %v1290_v5 }
 0x297   :  { %1175 = vmatprep.subr.bf16.mxu1 %v1440_v1 }
 0x29a   :  { %1176 = vmatpush3.bf16.msra.mxu1 %v1291_v6 }
 0x29b   :  { %1177 = vmatprep.subr.bf16.mxu1 %v1440_v1 }
 0x29e   :  { %1178 = vmatpush3.bf16.msra.mxu1 %v1292_v7 }
 0x2a1   :  { %1180 = vmatmul.mubr.bf16.vlgmr.msra.gmra.mxu1 %v1293_v8 }
 0x341   :  { %v765_v13 = vpop.f32.mrf.mxu1 }
 0x342   :  { %v766_v1 = vadd.f32 %v1066_v19, %v765_v13 }
 0x343   :  { %v1149_v14 = vpop.f32.mrf.mxu1 }
 0x344   :  { %v983_v24 = vmul.f32 %v857_v21, %v766_v1 }
 0x345   :  { %v768_v15 = vpop.f32.mrf.mxu1 }
 0x346   :  { %v769_v25 = vadd.f32 %v1066_v19, %v768_v15 }
 0x347   :  { %v1150_v18 = vpop.f32.mrf.mxu1 }
 0x348   :  { %v984_v31 = vmul.f32 %v860_v26, %v769_v25 }
 0x361   :  { %v976_v23 = vpop.f32.mrf.mxu1 }
 0x362   :  { %v977_v27 = vadd.f32 %v1082_v22, %v976_v23 }
 0x363   :  { %v1181_v28 = vpop.f32.mrf.mxu1 }
 0x364   :  { %v985_v29 = vadd.f32 %v983_v24, %v977_v27 }
 0x365   :  { %v979_v30 = vpop.f32.mrf.mxu1 }
 0x366   :  { %987 = vst [vmem:[#allocation11] sm:$0xff] %v985_v29  ;;  %v980_v32 = vadd.f32 %v1082_v22, %v979_v30 }
 0x367   :  { %v1182_v33 = vpop.f32.mrf.mxu1 }
 0x368   :  { %v986_v34 = vadd.f32 %v984_v31, %v980_v32 }
 0x36a   :  { %988 = vst [vmem:[#allocation11 + $0x8] sm:$0xff] %v986_v34 }
 0x36b   :  { %1413 = shalt.err (!%p1410_p1)
}
 0x36c   :  { %1000 = dma.vmem_to_hbm [thread:$0]  %s995_s9, 256, %s1655_s14, [#allocation4], %s1436_s15, %s1436_s15, %s1437_s16  }
 0x36d   :  { %1428 = dma.done.wait [#allocation4], 256  }
 0x36e   :  { %1429 = vsyncadd [#allocation4], 4294967040 }
 0x36f   :  { %1004 = vsyncpa [#allocation3], 1 }
 0x370   :  { %1005 = vsyncpa [#allocation6], 1 }
 0x371   :  { %1006 = vsyncpa [#allocation9], 1 }
 0x372   :  { %1007 = vsyncpa [#allocation4], 1 }

</bundles_post_ra>
